<compile_context>
chip_gen: v7x
topology: tpu7x:2x2x1
jax: 0.10.0
libtpu: 0.0.40
codegen_flags: <defaults>
</compile_context>

<pallas_src>
import jax
import jax.numpy as jnp
import numpy as np
from jax import lax
from jax.experimental import pallas as pl
from jax.experimental.pallas import tpu as pltpu


# ----------------------------- Pallas kernel --------------------------------
def lstm_acceptor_kernel(maxlen_ref,            # SMEM scalar prefetch: [1] int32
                         lens_ref,              # [TB, 1]  int32
                         xz_ref,                # [T, TB, 4*Hp] f32  (precomputed x@W_ih + b)
                         whh_ref,               # [Hp, 4*Hp] bf16
                         w1_ref, b1_ref,        # [Hp, Mp] bf16, [1, Mp] f32
                         w2_ref, b2_ref,        # [Mp, Op] bf16, [1, Op] f32 (pads = -1e30)
                         out_ref):              # [TB, Op] f32
    T, TB, G = xz_ref.shape
    Hp = whh_ref.shape[0]

    lens = lens_ref[...]                        # [TB, 1] int32
    whh = whh_ref[...]                          # hoisted: loaded once, lives in vregs/VMEM
    max_len = maxlen_ref[0]                     # dynamic trip count (<= T)

    h0 = jnp.zeros((TB, Hp), jnp.float32)
    c0 = jnp.zeros((TB, Hp), jnp.float32)

    def step(t, carry):
        h, c = carry
        # Only the recurrent matmul is on the latency-critical chain; the input
        # projection xz_ref[t] was precomputed (bias already folded in).
        z = xz_ref[t] + jnp.dot(h.astype(jnp.bfloat16), whh,
                                preferred_element_type=jnp.float32)     # [TB, 4Hp]
        # Gate order i, f, g, o (PyTorch convention); each slice is 128-lane aligned.
        i_g = jax.nn.sigmoid(z[:, 0 * Hp:1 * Hp])
        f_g = jax.nn.sigmoid(z[:, 1 * Hp:2 * Hp])
        g_g = jnp.tanh(z[:, 2 * Hp:3 * Hp])
        o_g = jax.nn.sigmoid(z[:, 3 * Hp:4 * Hp])
        c_new = f_g * c + i_g * g_g
        h_new = o_g * jnp.tanh(c_new)
        # Freeze the state once t >= original_length[b] (padding is trailing) so the
        # final h equals the hidden state at the last non-padding position.
        mask = t < lens                          # [TB, 1] bool, broadcasts over Hp
        return jnp.where(mask, h_new, h), jnp.where(mask, c_new, c)

    # Dynamic bound = max(lengths): trailing all-padding timesteps are skipped entirely.
    # TODO(synk): with a static, small T one could instead use unroll=True for LLO overlap.
    h, _ = lax.fori_loop(0, max_len, step, (h0, c0))

    # MLP head: Linear -> ReLU -> (Dropout: inference no-op) -> Linear -> Softmax(dim=1)
    hidden = jnp.maximum(
        jnp.dot(h.astype(jnp.bfloat16), w1_ref[...],
                preferred_element_type=jnp.float32) + b1_ref[...], 0.0)
    logits = jnp.dot(hidden.astype(jnp.bfloat16), w2_ref[...],
                     preferred_element_type=jnp.float32) + b2_ref[...]
    # Padded class lanes carry logit -1e30 -> exp underflows to exactly 0, so the softmax
    # over the 128-lane slab equals the softmax over the real O classes.
    m = jnp.max(logits, axis=1, keepdims=True)
    e = jnp.exp(logits - m)
    inv = pl.reciprocal(jnp.sum(e, axis=1, keepdims=True), approx=True)
    out_ref[...] = e * inv


# ------------------------------ Host wrapper ---------------------------------
def _round_up(x, m):
    return ((x + m - 1) // m) * m


def lstm_acceptor_forward(sequence, params, padding_idx):
    """sequence: int32 [B, T]. Returns softmax probabilities [B, O] (float32)."""
    emb_table = params["embedding"]                       # [V, D]
    B, T = sequence.shape
    D = emb_table.shape[1]
    H = params["w_hh"].shape[0]
    M = params["w1"].shape[1]
    O = params["w2"].shape[1]

    LANE, SUB = 128, 8
    Hp, Mp, Op = _round_up(H, LANE), _round_up(M, LANE), _round_up(O, LANE)
    TB = min(256, _round_up(B, SUB))                      # batch tile (fills MXU rows at scale)
    Bp = _round_up(B, TB)

    # ---- glue in plain JAX: lengths, embedding gather, hoisted input projection ----
    lengths = jnp.sum(sequence != padding_idx, axis=1).astype(jnp.int32)       # [B]
    max_len = jnp.max(lengths).astype(jnp.int32).reshape((1,))                 # SMEM scalar
    lengths_p = jnp.zeros((Bp, 1), jnp.int32).at[:B, 0].set(lengths)

    embedded = jnp.take(emb_table, sequence, axis=0)                           # [B, T, D]
    embedded = jnp.pad(embedded, ((0, Bp - B), (0, 0), (0, 0)))                # [Bp, T, D]

    # Gate-padded LSTM weights: each of the 4 gate slabs occupies a 128-lane-aligned
    # column block [k*Hp, k*Hp+H); padded rows/cols are zero (keeps padded h/c lanes == 0).
    def pad_gates(w, rows_to):                             # w: [rows, 4H] -> [rows_to, 4*Hp]
        rows = w.shape[0]
        wg = w.reshape(rows, 4, H)
        wg = jnp.pad(wg, ((0, rows_to - rows), (0, 0), (0, Hp - H)))
        return wg.reshape(rows_to, 4 * Hp)

    w_ih_p = pad_gates(params["w_ih"], D)                               # [D, 4Hp]  f32
    w_hh_p = pad_gates(params["w_hh"], Hp).astype(jnp.bfloat16)         # [Hp, 4Hp] bf16
    b_p = pad_gates(params["b_lstm"], 1)                                # [1, 4Hp]  f32

    # Hoisted input projection: one well-shaped [Bp*T, D] x [D, 4Hp] bf16 matmul with the
    # bias folded in, laid out time-major so the recurrent step is a leading-axis load.
    x_proj = jnp.einsum("btd,dg->btg",
                        embedded.astype(jnp.bfloat16), w_ih_p.astype(jnp.bfloat16),
                        preferred_element_type=jnp.float32) + b_p              # [Bp, T, 4Hp]
    x_proj = jnp.transpose(x_proj, (1, 0, 2))                                  # [T, Bp, 4Hp]
    # TODO(synk): for production T on v7x (64 MiB VMEM), stream x_proj per T-chunk from HBM
    # (memory_space=pl.ANY + make_async_copy double buffer) instead of keeping it resident.

    w1_p = jnp.pad(params["w1"], ((0, Hp - H), (0, Mp - M))).astype(jnp.bfloat16)
    b1_p = jnp.pad(params["b1"], ((0, 0), (0, Mp - M)))
    w2_p = jnp.pad(params["w2"], ((0, Mp - M), (0, Op - O))).astype(jnp.bfloat16)
    b2_p = jnp.pad(params["b2"], ((0, 0), (0, Op - O)), constant_values=-1e30)

    grid_spec = pltpu.PrefetchScalarGridSpec(
        num_scalar_prefetch=1,                       # max_len lands in SMEM
        grid=(Bp // TB,),
        in_specs=[
            pl.BlockSpec((TB, 1), lambda b, ml: (b, 0)),            # lengths
            pl.BlockSpec((T, TB, 4 * Hp), lambda b, ml: (0, b, 0)),  # x_proj (time-major)
            pl.BlockSpec((Hp, 4 * Hp), lambda b, ml: (0, 0)),        # w_hh
            pl.BlockSpec((Hp, Mp), lambda b, ml: (0, 0)),            # w1
            pl.BlockSpec((1, Mp), lambda b, ml: (0, 0)),             # b1
            pl.BlockSpec((Mp, Op), lambda b, ml: (0, 0)),            # w2
            pl.BlockSpec((1, Op), lambda b, ml: (0, 0)),             # b2
        ],
        out_specs=pl.BlockSpec((TB, Op), lambda b, ml: (b, 0)),      # lane-dense output slab
    )

    out = pl.pallas_call(
        lstm_acceptor_kernel,
        out_shape=jax.ShapeDtypeStruct((Bp, Op), jnp.float32),
        grid_spec=grid_spec,
        compiler_params=pltpu.CompilerParams(
            dimension_semantics=("parallel",),       # batch tiles shard across TCs (v7x)
            vmem_limit_bytes=48 * 1024 * 1024,
        ),
    )(max_len, lengths_p, x_proj, w_hh_p, w1_p, b1_p, w2_p, b2_p)

    return out[:B, :O]


# ------------------------- Deterministic parameters --------------------------
def init_params(key, vocab_size, D, H, M, O, padding_idx):
    ks = jax.random.split(key, 8)
    scale = 0.1
    emb = scale * jax.random.normal(ks[0], (vocab_size, D), jnp.float32)
    emb = emb.at[padding_idx].set(0.0)                     # padding_idx row = 0
    return {
        "embedding": emb,
        "w_ih": scale * jax.random.normal(ks[1], (D, 4 * H), jnp.float32),
        "w_hh": scale * jax.random.normal(ks[2], (H, 4 * H), jnp.float32),
        "b_lstm": scale * jax.random.normal(ks[3], (1, 4 * H), jnp.float32),
        "w1": scale * jax.random.normal(ks[4], (H, M), jnp.float32),
        "b1": scale * jax.random.normal(ks[5], (1, M), jnp.float32),
        "w2": scale * jax.random.normal(ks[6], (M, O), jnp.float32),
        "b2": scale * jax.random.normal(ks[7], (1, O), jnp.float32),
    }


# --------------------------- Pure-JAX reference -------------------------------
def reference_forward(sequence, params, padding_idx):
    lengths = jnp.sum(sequence != padding_idx, axis=1)[:, None]
    x = jnp.take(params["embedding"], sequence, axis=0)    # [B, T, D]
    B, T, D = x.shape
    H = params["w_hh"].shape[0]
    h = jnp.zeros((B, H), jnp.float32)
    c = jnp.zeros((B, H), jnp.float32)
    for t in range(T):
        z = x[:, t, :] @ params["w_ih"] + h @ params["w_hh"] + params["b_lstm"]
        i = jax.nn.sigmoid(z[:, 0 * H:1 * H])
        f = jax.nn.sigmoid(z[:, 1 * H:2 * H])
        g = jnp.tanh(z[:, 2 * H:3 * H])
        o = jax.nn.sigmoid(z[:, 3 * H:4 * H])
        c_new = f * c + i * g
        h_new = o * jnp.tanh(c_new)
        mask = t < lengths
        h = jnp.where(mask, h_new, h)
        c = jnp.where(mask, c_new, c)
    hid = jnp.maximum(h @ params["w1"] + params["b1"], 0.0)
    logits = hid @ params["w2"] + params["b2"]
    return jax.nn.softmax(logits, axis=1)


if __name__ == "__main__":
    # Small shapes consistent with the module's forward.
    B, T = 2, 8
    VOCAB, D, H, M, O = 16, 32, 32, 32, 4
    PADDING_IDX = 0

    key = jax.random.PRNGKey(0)
    k_seq, k_par = jax.random.split(key)

    # Deterministic tokens with TRAILING padding: row 0 length 7, row 1 length 6
    # (so max(lengths)=7 < T, exercising the dynamic recurrence bound).
    seq = jax.random.randint(k_seq, (B, T), 1, VOCAB, dtype=jnp.int32)
    seq = seq.at[0, 7:].set(PADDING_IDX)
    seq = seq.at[1, 6:].set(PADDING_IDX)

    params = init_params(k_par, VOCAB, D, H, M, O, PADDING_IDX)

    out = lstm_acceptor_forward(seq, params, PADDING_IDX)
    out = jax.block_until_ready(out)

    ref = reference_forward(seq, params, PADDING_IDX)
    assert out.shape == (B, O)
    # bf16 MXU operands + approx reciprocal -> relaxed tolerance vs the f32 reference.
    assert np.allclose(np.asarray(out), np.asarray(ref), atol=2e-2, rtol=2e-2)
    assert np.allclose(np.asarray(out).sum(axis=1), 1.0, atol=1e-2)

    # TODO(synk): utils.LSTM source not provided; standard PyTorch LSTM cell semantics
    # (gate order i,f,g,o; single combined bias b_ih+b_hh) assumed for acceptor_forward.
    print("KERNEL_OK")
</pallas_src>

<mosaic_0001>
module attributes {stable_mosaic.version = 11 : i64} {
  func.func @lstm_acceptor_kernel(%arg0: i32, %arg1: memref<1xi32, #tpu.memory_space<smem>>, %arg2: memref<8x1xi32, #tpu.memory_space<vmem>>, %arg3: memref<8x8x512xf32, #tpu.memory_space<vmem>>, %arg4: memref<128x512xbf16, #tpu.memory_space<vmem>>, %arg5: memref<128x128xbf16, #tpu.memory_space<vmem>>, %arg6: memref<1x128xf32, #tpu.memory_space<vmem>>, %arg7: memref<128x128xbf16, #tpu.memory_space<vmem>>, %arg8: memref<1x128xf32, #tpu.memory_space<vmem>>, %arg9: memref<8x128xf32, #tpu.memory_space<vmem>>) attributes {dimension_semantics = [#tpu.dimension_semantics<parallel>], iteration_bounds = array<i64: 1>, scalar_prefetch = 1 : i64, scratch_operands = 0 : i64, tpu.core_type = #tpu.core_type<tc>, window_params = [{transform_indices = @transform_0, window_bounds = array<i64: 8, 1>}, {transform_indices = @transform_1, window_bounds = array<i64: 8, 8, 512>}, {pipeline_mode = #tpu.pipeline_mode<synchronous>, transform_indices = @transform_2, window_bounds = array<i64: 128, 512>}, {pipeline_mode = #tpu.pipeline_mode<synchronous>, transform_indices = @transform_3, window_bounds = array<i64: 128, 128>}, {pipeline_mode = #tpu.pipeline_mode<synchronous>, transform_indices = @transform_4, window_bounds = array<i64: 1, 128>}, {pipeline_mode = #tpu.pipeline_mode<synchronous>, transform_indices = @transform_5, window_bounds = array<i64: 128, 128>}, {pipeline_mode = #tpu.pipeline_mode<synchronous>, transform_indices = @transform_6, window_bounds = array<i64: 1, 128>}, {transform_indices = @transform_7, window_bounds = array<i64: 8, 128>}]} {
    %c0 = arith.constant 0 : index
    %c0_0 = arith.constant 0 : index
    %0 = vector.load %arg2[%c0, %c0_0] : memref<8x1xi32, #tpu.memory_space<vmem>>, vector<8x1xi32>
    %c0_1 = arith.constant 0 : index
    %c0_2 = arith.constant 0 : index
    %1 = vector.load %arg4[%c0_1, %c0_2] : memref<128x512xbf16, #tpu.memory_space<vmem>>, vector<128x512xbf16>
    %c0_3 = arith.constant 0 : index
    %2 = memref.load %arg1[%c0_3] : memref<1xi32, #tpu.memory_space<smem>>
    %cst = arith.constant 0.000000e+00 : f32
    %3 = vector.broadcast %cst : f32 to vector<8x128xf32>
    %cst_4 = arith.constant 0.000000e+00 : f32
    %4 = vector.broadcast %cst_4 : f32 to vector<8x128xf32>
    %c0_i32 = arith.constant 0 : i32
    %5 = arith.subi %2, %c0_i32 : i32
    %6 = arith.addi %c0_i32, %5 : i32
    %c1_i32 = arith.constant 1 : i32
    %7:2 = scf.for %arg10 = %c0_i32 to %6 step %c1_i32 iter_args(%arg11 = %3, %arg12 = %4) -> (vector<8x128xf32>, vector<8x128xf32>)  : i32 {
      %33 = arith.index_cast %arg10 : i32 to index
      %c0_20 = arith.constant 0 : index
      %c0_21 = arith.constant 0 : index
      %34 = vector.load %arg3[%33, %c0_20, %c0_21] : memref<8x8x512xf32, #tpu.memory_space<vmem>>, vector<1x8x512xf32>
      %35 = vector.shape_cast %34 : vector<1x8x512xf32> to vector<8x512xf32>
      %36 = arith.truncf %arg11 : vector<8x128xf32> to vector<8x128xbf16>
      %cst_22 = arith.constant dense<0.000000e+00> : vector<8x512xf32>
      %37 = tpu.matmul %36, %1, %cst_22 {dimension_numbers = #tpu.dot_dimension_numbers<[1], [0], [0], [1], [0, 0, 1, 1], [], []>} : vector<8x128xbf16>, vector<128x512xbf16>, vector<8x512xf32> -> vector<8x512xf32>
      %38 = arith.addf %35, %37 : vector<8x512xf32>
      %39 = vector.extract_strided_slice %38 {offsets = [0, 0], sizes = [8, 128], strides = [1, 1]} : vector<8x512xf32> to vector<8x128xf32>
      %40 = arith.negf %39 : vector<8x128xf32>
      %41 = math.exp %40 : vector<8x128xf32>
      %cst_23 = arith.constant 1.000000e+00 : f32
      %42 = vector.broadcast %cst_23 : f32 to vector<8x128xf32>
      %43 = arith.addf %42, %41 : vector<8x128xf32>
      %44 = arith.divf %42, %43 : vector<8x128xf32>
      %45 = vector.extract_strided_slice %38 {offsets = [0, 128], sizes = [8, 128], strides = [1, 1]} : vector<8x512xf32> to vector<8x128xf32>
      %46 = arith.negf %45 : vector<8x128xf32>
      %47 = math.exp %46 : vector<8x128xf32>
      %cst_24 = arith.constant 1.000000e+00 : f32
      %48 = vector.broadcast %cst_24 : f32 to vector<8x128xf32>
      %49 = arith.addf %48, %47 : vector<8x128xf32>
      %50 = arith.divf %48, %49 : vector<8x128xf32>
      %51 = vector.extract_strided_slice %38 {offsets = [0, 256], sizes = [8, 128], strides = [1, 1]} : vector<8x512xf32> to vector<8x128xf32>
      %52 = math.tanh %51 : vector<8x128xf32>
      %53 = vector.extract_strided_slice %38 {offsets = [0, 384], sizes = [8, 128], strides = [1, 1]} : vector<8x512xf32> to vector<8x128xf32>
      %54 = arith.negf %53 : vector<8x128xf32>
      %55 = math.exp %54 : vector<8x128xf32>
      %cst_25 = arith.constant 1.000000e+00 : f32
      %56 = vector.broadcast %cst_25 : f32 to vector<8x128xf32>
      %57 = arith.addf %56, %55 : vector<8x128xf32>
      %58 = arith.divf %56, %57 : vector<8x128xf32>
      %59 = arith.mulf %50, %arg12 : vector<8x128xf32>
      %60 = arith.mulf %44, %52 : vector<8x128xf32>
      %61 = arith.addf %59, %60 : vector<8x128xf32>
      %62 = math.tanh %61 : vector<8x128xf32>
      %63 = arith.mulf %58, %62 : vector<8x128xf32>
      %64 = vector.broadcast %arg10 : i32 to vector<8x1xi32>
      %65 = arith.cmpi slt, %64, %0 : vector<8x1xi32>
      %66 = vector.shape_cast %65 : vector<8x1xi1> to vector<8x1xi1>
      %67 = vector.broadcast %66 : vector<8x1xi1> to vector<8x128xi1>
      %68 = arith.select %67, %63, %arg11 : vector<8x128xi1>, vector<8x128xf32>
      %69 = vector.shape_cast %65 : vector<8x1xi1> to vector<8x1xi1>
      %70 = vector.broadcast %69 : vector<8x1xi1> to vector<8x128xi1>
      %71 = arith.select %70, %61, %arg12 : vector<8x128xi1>, vector<8x128xf32>
      scf.yield %68, %71 : vector<8x128xf32>, vector<8x128xf32>
    }
    %8 = arith.truncf %7#0 : vector<8x128xf32> to vector<8x128xbf16>
    %c0_5 = arith.constant 0 : index
    %c0_6 = arith.constant 0 : index
    %9 = vector.load %arg5[%c0_5, %c0_6] : memref<128x128xbf16, #tpu.memory_space<vmem>>, vector<128x128xbf16>
    %cst_7 = arith.constant dense<0.000000e+00> : vector<8x128xf32>
    %10 = tpu.matmul %8, %9, %cst_7 {dimension_numbers = #tpu.dot_dimension_numbers<[1], [0], [0], [1], [0, 0, 1, 1], [], []>} : vector<8x128xbf16>, vector<128x128xbf16>, vector<8x128xf32> -> vector<8x128xf32>
    %c0_8 = arith.constant 0 : index
    %c0_9 = arith.constant 0 : index
    %11 = vector.load %arg6[%c0_8, %c0_9] : memref<1x128xf32, #tpu.memory_space<vmem>>, vector<1x128xf32>
    %12 = vector.broadcast %11 : vector<1x128xf32> to vector<8x128xf32>
    %13 = arith.addf %10, %12 : vector<8x128xf32>
    %cst_10 = arith.constant 0.000000e+00 : f32
    %14 = vector.broadcast %cst_10 : f32 to vector<8x128xf32>
    %15 = arith.maximumf %13, %14 : vector<8x128xf32>
    %16 = arith.truncf %15 : vector<8x128xf32> to vector<8x128xbf16>
    %c0_11 = arith.constant 0 : index
    %c0_12 = arith.constant 0 : index
    %17 = vector.load %arg7[%c0_11, %c0_12] : memref<128x128xbf16, #tpu.memory_space<vmem>>, vector<128x128xbf16>
    %cst_13 = arith.constant dense<0.000000e+00> : vector<8x128xf32>
    %18 = tpu.matmul %16, %17, %cst_13 {dimension_numbers = #tpu.dot_dimension_numbers<[1], [0], [0], [1], [0, 0, 1, 1], [], []>} : vector<8x128xbf16>, vector<128x128xbf16>, vector<8x128xf32> -> vector<8x128xf32>
    %c0_14 = arith.constant 0 : index
    %c0_15 = arith.constant 0 : index
    %19 = vector.load %arg8[%c0_14, %c0_15] : memref<1x128xf32, #tpu.memory_space<vmem>>, vector<1x128xf32>
    %20 = vector.broadcast %19 : vector<1x128xf32> to vector<8x128xf32>
    %21 = arith.addf %18, %20 : vector<8x128xf32>
    %cst_16 = arith.constant dense<0xFF800000> : vector<8xf32>
    %22 = vector.multi_reduction <maximumf>, %21, %cst_16 [1] : vector<8x128xf32> to vector<8xf32>
    %23 = vector.shape_cast %22 : vector<8xf32> to vector<8x1xf32>
    %24 = vector.broadcast %23 : vector<8x1xf32> to vector<8x128xf32>
    %25 = arith.subf %21, %24 : vector<8x128xf32>
    %26 = math.exp %25 : vector<8x128xf32>
    %cst_17 = arith.constant dense<0.000000e+00> : vector<8xf32>
    %27 = vector.multi_reduction <add>, %26, %cst_17 [1] : vector<8x128xf32> to vector<8xf32>
    %28 = vector.shape_cast %27 : vector<8xf32> to vector<8x1xf32>
    %29 = tpu.reciprocal %28 {approx = true} : vector<8x1xf32> -> vector<8x1xf32>
    %30 = vector.broadcast %29 : vector<8x1xf32> to vector<8x128xf32>
    %31 = arith.mulf %26, %30 : vector<8x128xf32>
    %c0_18 = arith.constant 0 : index
    %c0_19 = arith.constant 0 : index
    %32 = vector.load %arg9[%c0_18, %c0_19] : memref<8x128xf32, #tpu.memory_space<vmem>>, vector<8x128xf32>
    tpu.vector_store %arg9[%c0_18, %c0_19], %31 {strides = array<i32>} : memref<8x128xf32, #tpu.memory_space<vmem>>, vector<8x128xf32>,
    return
  }
  func.func @transform_0(%arg0: i32, %arg1: memref<1xi32, #tpu.memory_space<smem>>) -> (i32, i32) {
    %c0_i32 = arith.constant 0 : i32
    %c0_i32_0 = arith.constant 0 : i32
    return %arg0, %c0_i32 : i32, i32
  }
  func.func @transform_1(%arg0: i32, %arg1: memref<1xi32, #tpu.memory_space<smem>>) -> (i32, i32, i32) {
    %c0_i32 = arith.constant 0 : i32
    %c0_i32_0 = arith.constant 0 : i32
    %c0_i32_1 = arith.constant 0 : i32
    return %c0_i32, %arg0, %c0_i32_0 : i32, i32, i32
  }
  func.func @transform_2(%arg0: i32, %arg1: memref<1xi32, #tpu.memory_space<smem>>) -> (i32, i32) {
    %c0_i32 = arith.constant 0 : i32
    %c0_i32_0 = arith.constant 0 : i32
    %c0_i32_1 = arith.constant 0 : i32
    return %c0_i32, %c0_i32_0 : i32, i32
  }
  func.func @transform_3(%arg0: i32, %arg1: memref<1xi32, #tpu.memory_space<smem>>) -> (i32, i32) {
    %c0_i32 = arith.constant 0 : i32
    %c0_i32_0 = arith.constant 0 : i32
    %c0_i32_1 = arith.constant 0 : i32
    return %c0_i32, %c0_i32_0 : i32, i32
  }
  func.func @transform_4(%arg0: i32, %arg1: memref<1xi32, #tpu.memory_space<smem>>) -> (i32, i32) {
    %c0_i32 = arith.constant 0 : i32
    %c0_i32_0 = arith.constant 0 : i32
    %c0_i32_1 = arith.constant 0 : i32
    return %c0_i32, %c0_i32_0 : i32, i32
  }
  func.func @transform_5(%arg0: i32, %arg1: memref<1xi32, #tpu.memory_space<smem>>) -> (i32, i32) {
    %c0_i32 = arith.constant 0 : i32
    %c0_i32_0 = arith.constant 0 : i32
    %c0_i32_1 = arith.constant 0 : i32
    return %c0_i32, %c0_i32_0 : i32, i32
  }
  func.func @transform_6(%arg0: i32, %arg1: memref<1xi32, #tpu.memory_space<smem>>) -> (i32, i32) {
    %c0_i32 = arith.constant 0 : i32
    %c0_i32_0 = arith.constant 0 : i32
    %c0_i32_1 = arith.constant 0 : i32
    return %c0_i32, %c0_i32_0 : i32, i32
  }
  func.func @transform_7(%arg0: i32, %arg1: memref<1xi32, #tpu.memory_space<smem>>) -> (i32, i32) {
    %c0_i32 = arith.constant 0 : i32
    %c0_i32_0 = arith.constant 0 : i32
    return %arg0, %c0_i32 : i32, i32
  }
}

</mosaic_0001>

<bundles_post_ra>
// kernel: tpu_custom_call.1
= control target key start
LH: loop header
LB: loop body
LE: loop exit
PB: predicated region body
PF: predicated region fallthrough
CT: control target
= control target key end

     0   :  { %14 = vsyncpa [#allocation5], 0  ;;  %s1326_s0 = inlined_call_operand.<no memory space> [shape: s32[1], index: 0, kind: input, shape index: {}]   ;;  %s1327_s1 = inlined_call_operand.vmem [shape: s32[8,1], index: 1, kind: input, shape index: {}]   ;;  %s1328_s2 = inlined_call_operand.hbm [shape: f32[8,8,512], index: 2, kind: input, shape index: {}]   ;;  %s1329_s3 = inlined_call_operand.hbm [shape: bf16[128,512], index: 3, kind: input, shape index: {}]   ;;  %s1330_s4 = inlined_call_operand.hbm [shape: bf16[128,128], index: 4, kind: input, shape index: {}]   ;;  %s1331_s5 = inlined_call_operand.vmem [shape: f32[1,128], index: 5, kind: input, shape index: {}]   ;;  %s1332_s6 = inlined_call_operand.hbm [shape: bf16[128,128], index: 6, kind: input, shape index: {}]   ;;  %s1333_s7 = inlined_call_operand.vmem [shape: f32[1,128], index: 7, kind: input, shape index: {}]   ;;  %s1334_s8 = inlined_call_operand.hbm [shape: f32[8,128], index: 8, kind: output, shape index: {}]  }
   0x1   :  { %15 = vsyncpa [#allocation8], 0 }
   0x2   :  { %16 = vsyncpa [#allocation11], 0 }
   0x3   :  { %17 = vsyncpa [#allocation6], 0  ;;  %s1027_s27 = smov [#allocation7]   ;;  %s877_s9 = scalar_lea.hbm %s1329_s3, 4096 }
   0x4   :  { %s37_s28 = sshll.u32 %s1027_s27, 4  ;;  %p878_p0 = scmp.ne.s32.totalorder %s1329_s3, %s877_s9  ;;  %s38_s28 = int_to_ptr.vmem [resolvable:$true] %s37_s28 }
   0x5   :  { %p881_p1 = scmp.lt.u32.totalorder %s877_s9, %s1329_s3 }
   0x7   :  { %p883_p2 = pnand %p881_p1, %p878_p0 }
   0x9   :  { %886 = shalt.err (!%p883_p2)
}
   0xa   :  { %s887_s14 = scalar_lea.vmem %s38_s28, 4096  ;;  %p892_p4 = scmp.lt.s32.totalorder %s38_s28, %s38_s28 }
   0xb   :  { %p888_p3 = scmp.ne.s32.totalorder %s38_s28, %s887_s14  ;;  %p893_p5 = scmp.lt.s32.totalorder %s887_s14, %s887_s14 }
   0xd   :  { %p894_p6 = por %p893_p5, %p892_p4 }
   0xf   :  { %p895_p7 = pnand %p894_p6, %p888_p3 }
  0x11   :  { %898 = shalt.err (!%p895_p7)
}
  0x12   :  { %s1028_s15 = smov 256   ;;  %s1029_s16 = smov 16  }
  0x13   :  { %43 = dma.hbm_to_vmem [thread:$0]  %s1329_s3, 4096, %s38_s28, [#allocation8], %s1028_s15, %s1028_s15, %s1029_s16  }
  0x14   :  { %s1030_s19 = smov [#allocation4]   ;;  %s899_s23 = scalar_lea.hbm %s1328_s2, 4096 }
  0x15   :  { %s25_s20 = sshll.u32 %s1030_s19, 4  ;;  %p900_p8 = scmp.ne.s32.totalorder %s1328_s2, %s899_s23  ;;  %s26_s20 = int_to_ptr.vmem [resolvable:$true] %s25_s20 }
  0x16   :  { %p903_p9 = scmp.lt.u32.totalorder %s899_s23, %s1328_s2 }
  0x18   :  { %p905_p10 = pnand %p903_p9, %p900_p8 }
  0x1a   :  { %908 = shalt.err (!%p905_p10)
}
  0x1b   :  { %s909_s29 = scalar_lea.vmem %s26_s20, 4096  ;;  %p914_p12 = scmp.lt.s32.totalorder %s26_s20, %s26_s20 }
  0x1c   :  { %p910_p11 = scmp.ne.s32.totalorder %s26_s20, %s909_s29  ;;  %p915_p13 = scmp.lt.s32.totalorder %s909_s29, %s909_s29 }
  0x1e   :  { %p916_p0 = por %p915_p13, %p914_p12 }
  0x20   :  { %p917_p1 = pnand %p916_p0, %p910_p11 }
  0x22   :  { %920 = shalt.err (!%p917_p1)
}
  0x23   :  { %s1031_s3 = smov 512   ;;  %s1032_s28 = smov 32  }
  0x24   :  { %31 = dma.hbm_to_vmem [thread:$0]  %s1328_s2, 4096, %s26_s20, [#allocation5], %s1031_s3, %s1031_s3, %s1032_s28  }
  0x25   :  { %s1033_s10 = smov [#allocation9]   ;;  %s921_s14 = scalar_lea.hbm %s1330_s4, 1024 }
  0x26   :  { %s49_s11 = sshll.u32 %s1033_s10, 4  ;;  %p922_p2 = scmp.ne.s32.totalorder %s1330_s4, %s921_s14  ;;  %s50_s11 = int_to_ptr.vmem [resolvable:$true] %s49_s11 }
  0x27   :  { %p925_p3 = scmp.lt.u32.totalorder %s921_s14, %s1330_s4 }
  0x29   :  { %p927_p4 = pnand %p925_p3, %p922_p2 }
  0x2b   :  { %930 = shalt.err (!%p927_p4)
}
  0x2c   :  { %s931_s19 = scalar_lea.vmem %s50_s11, 1024  ;;  %p936_p6 = scmp.lt.s32.totalorder %s50_s11, %s50_s11 }
  0x2d   :  { %p932_p5 = scmp.ne.s32.totalorder %s50_s11, %s931_s19  ;;  %p937_p7 = scmp.lt.s32.totalorder %s931_s19, %s931_s19 }
  0x2f   :  { %p938_p8 = por %p937_p7, %p936_p6 }
  0x31   :  { %p939_p9 = pnand %p938_p8, %p932_p5 }
  0x33   :  { %942 = shalt.err (!%p939_p9)
}
  0x34   :  { %s1034_s2 = smov 64   ;;  %s1035_s20 = smov 4  }
  0x35   :  { %55 = dma.hbm_to_vmem [thread:$0]  %s1330_s4, 1024, %s50_s11, [#allocation8], %s1034_s2, %s1034_s2, %s1035_s20  }
  0x36   :  { %s1036_s23 = smov [#allocation10]   ;;  %s943_s27 = scalar_lea.hbm %s1332_s6, 1024 }
  0x37   :  { %s63_s24 = sshll.u32 %s1036_s23, 4  ;;  %p944_p10 = scmp.ne.s32.totalorder %s1332_s6, %s943_s27  ;;  %s64_s24 = int_to_ptr.vmem [resolvable:$true] %s63_s24 }
  0x38   :  { %p947_p11 = scmp.lt.u32.totalorder %s943_s27, %s1332_s6 }
  0x3a   :  { %p949_p12 = pnand %p947_p11, %p944_p10 }
  0x3c   :  { %952 = shalt.err (!%p949_p12)
}
  0x3d   :  { %s953_s9 = scalar_lea.vmem %s64_s24, 1024  ;;  %p958_p0 = scmp.lt.s32.totalorder %s64_s24, %s64_s24 }
  0x3e   :  { %p954_p13 = scmp.ne.s32.totalorder %s64_s24, %s953_s9  ;;  %p959_p1 = scmp.lt.s32.totalorder %s953_s9, %s953_s9 }
  0x40   :  { %p960_p2 = por %p959_p1, %p958_p0 }
  0x42   :  { %p961_p3 = pnand %p960_p2, %p954_p13 }
  0x44   :  { %964 = shalt.err (!%p961_p3)
}
  0x45   :  { %69 = dma.hbm_to_vmem [thread:$0]  %s1332_s6, 1024, %s64_s24, [#allocation11], %s1034_s2, %s1034_s2, %s1035_s20  }
  0x46   :  { %1003 = dma.done.wait [#allocation5], 4096  }
  0x47   :  { %1004 = vsyncadd [#allocation5], 4294963200 }
  0x48   :  { %1005 = dma.done.wait [#allocation8], 5120  }
  0x49   :  { %1006 = vsyncadd [#allocation8], 4294962176 }
  0x4a   :  { %1007 = dma.done.wait [#allocation11], 1024  }
  0x4b   :  { %1008 = vsyncadd [#allocation11], 4294966272  ;;  %v1137_v0 = vld [vmem:[%s1327_s1] sm:$0xff]  ;;  %v1141_v2 = vld [vmem:[#allocation7 + $0x8] sm:$0xff]  ;;  %p679_p4 = scmp.le.s32.totalorder %s1326_s0, 0  ;;  %v1206_v33 = vmov 0.0  }
  0x4c   :  { %v1139_v1 = vld [vmem:[#allocation7] sm:$0xff]  ;;  %v1143_v3 = vld [vmem:[#allocation7 + $0x10] sm:$0xff]  ;;  %v1145_v4 = vld [vmem:[#allocation7 + $0x18] sm:$0xff]  ;;  %v1208_v34 = vmov (!%p679_p4), 0.0   ;;  %v1210_v35 = vmov (!%p679_p4), 0.0   ;;  %s1212_s13 = smov (!%p679_p4), 0  }
  0x4d   :  { %v1147_v5 = vld [vmem:[#allocation7 + $0x20] sm:$0xff]  ;;  %v1149_v6 = vld [vmem:[#allocation7 + $0x28] sm:$0xff]  ;;  %v1151_v7 = vld [vmem:[#allocation7 + $0x30] sm:$0xff] }
  0x4e   :  { %v1153_v8 = vld [vmem:[#allocation7 + $0x38] sm:$0xff]  ;;  %v1155_v9 = vld [vmem:[#allocation7 + $0x40] sm:$0xff]  ;;  %v1157_v10 = vld [vmem:[#allocation7 + $0x48] sm:$0xff] }
  0x4f   :  { %v1159_v11 = vld [vmem:[#allocation7 + $0x50] sm:$0xff]  ;;  %v1161_v12 = vld [vmem:[#allocation7 + $0x58] sm:$0xff]  ;;  %v1163_v13 = vld [vmem:[#allocation7 + $0x60] sm:$0xff] }
  0x50   :  { %v1165_v14 = vld [vmem:[#allocation7 + $0x68] sm:$0xff]  ;;  %v1167_v15 = vld [vmem:[#allocation7 + $0x70] sm:$0xff]  ;;  %v1169_v16 = vld [vmem:[#allocation7 + $0x78] sm:$0xff]  ;;  %672 = sbr.rel (%p679_p4) target bundleno = 381 (0x17d), region = 66 }
  0x51   :  { %v1171_v17 = vld [vmem:[#allocation7 + $0x80] sm:$0xff]  ;;  %v1173_v18 = vld [vmem:[#allocation7 + $0x88] sm:$0xff]  ;;  %v1175_v19 = vld [vmem:[#allocation7 + $0x90] sm:$0xff] }
  0x52   :  { %v1177_v20 = vld [vmem:[#allocation7 + $0x98] sm:$0xff]  ;;  %v1179_v21 = vld [vmem:[#allocation7 + $0xa0] sm:$0xff]  ;;  %v1181_v22 = vld [vmem:[#allocation7 + $0xa8] sm:$0xff] }
  0x53   :  { %v1183_v23 = vld [vmem:[#allocation7 + $0xb0] sm:$0xff]  ;;  %v1185_v24 = vld [vmem:[#allocation7 + $0xb8] sm:$0xff]  ;;  %v1187_v25 = vld [vmem:[#allocation7 + $0xc0] sm:$0xff] }
  0x54   :  { %v1189_v26 = vld [vmem:[#allocation7 + $0xc8] sm:$0xff]  ;;  %v1191_v27 = vld [vmem:[#allocation7 + $0xd0] sm:$0xff]  ;;  %v1193_v28 = vld [vmem:[#allocation7 + $0xd8] sm:$0xff] }
  0x55   :  { %v1195_v29 = vld [vmem:[#allocation7 + $0xe0] sm:$0xff]  ;;  %v1197_v30 = vld [vmem:[#allocation7 + $0xe8] sm:$0xff]  ;;  %v1199_v31 = vld [vmem:[#allocation7 + $0xf0] sm:$0xff] }
  0x56   :  { %v1201_v32 = vld [vmem:[#allocation7 + $0xf8] sm:$0xff] }
  0x57 LB: > { %v683_v36 = vcombine.high %v1139_v1, %v1143_v3  ;;  %v682_v37 = vcombine.low %v1139_v1, %v1143_v3  ;;  %v687_v38 = vcombine.high %v1147_v5, %v1151_v7  ;;  %v685_v39 = vcombine.high %v1141_v2, %v1145_v4  ;;  %s735_s14 = sshll.u32 %s1021_s13, 5  ;;  %s1021_s13 = sphi %s1212_s13, %s122_s13   ;;  %v1017_v35 = vphi %v1210_v35, %v1335_v35   ;;  %v1013_v34 = vphi %v1208_v34, %v413_v34  }
  0x58   : > { %v684_v40 = vcombine.low %v1141_v2, %v1145_v4  ;;  %v689_v41 = vcombine.high %v1149_v6, %v1153_v8  ;;  %v686_v42 = vcombine.low %v1147_v5, %v1151_v7  ;;  %v691_v43 = vcombine.high %v1155_v9, %v1159_v11  ;;  %s129_s15 = scalar_lea.vmem [#allocation4], %s735_s14 }
  0x59   : > { %295 = vmatprep.subr.bf16.mxu0 %v683_v36  ;;  %336 = vmatprep.subr.bf16.mxu1 %v685_v39  ;;  %v688_v44 = vcombine.low %v1149_v6, %v1153_v8  ;;  %v693_v45 = vcombine.high %v1157_v10, %v1161_v12  ;;  %v1037_v46 = vmov 0   ;;  %v690_v47 = vcombine.low %v1155_v9, %v1159_v11 }
  0x5a   : > { %296 = vmatpush1.bf16.msra.mxu0 %v682_v37  ;;  %337 = vmatpush1.bf16.msra.mxu1 %v684_v40  ;;  %v695_v48 = vcombine.high %v1163_v13, %v1167_v15  ;;  %v692_v49 = vcombine.low %v1157_v10, %v1161_v12  ;;  %v405_v50 = vstv %s1021_s13  ;;  %v697_v51 = vcombine.high %v1165_v14, %v1169_v16  ;;  %s122_s13 = sadd.s32 1, %s1021_s13  }
  0x5b   : > { %297 = vmatprep.subr.bf16.mxu0 %v687_v38  ;;  %338 = vmatprep.subr.bf16.mxu1 %v689_v41  ;;  %vm406_vm0 = vcmp.lt.s32.totalorder %v405_v50, %v1137_v0  ;;  %v694_v53 = vcombine.low %v1163_v13, %v1167_v15  ;;  %v699_v54 = vcombine.high %v1171_v17, %v1175_v19  ;;  %p121_p5 = scmp.ge.s32.totalorder %s122_s13, %s1326_s0 }
  0x5c   : > { %327 = vmatprep.mubr.bf16.mxu0 %v1037_v46  ;;  %368 = vmatprep.mubr.bf16.mxu1 %v1037_v46  ;;  %v407_v52 = vsel %vm406_vm0, 1, %v1037_v46  ;;  %v696_v55 = vcombine.low %v1165_v14, %v1169_v16  ;;  %v701_v56 = vcombine.high %v1173_v18, %v1177_v20  ;;  %v698_v57 = vcombine.low %v1171_v17, %v1175_v19 }
  0x5d   : > { %840 = vset.pattern.permute.xlu0 %v1037_v46  ;;  %v703_v58 = vcombine.high %v1179_v21, %v1183_v23  ;;  %v700_v59 = vcombine.low %v1173_v18, %v1177_v20  ;;  %v705_v60 = vcombine.high %v1181_v22, %v1185_v24  ;;  %v702_v61 = vcombine.low %v1179_v21, %v1183_v23 }
  0x5e   : > { %298 = vmatpush1.bf16.msra.mxu0 %v686_v42  ;;  %339 = vmatpush1.bf16.msra.mxu1 %v688_v44  ;;  %v707_v62 = vcombine.high %v1187_v25, %v1191_v27  ;;  %v704_v63 = vcombine.low %v1181_v22, %v1185_v24  ;;  %v709_v33 = vcombine.high %v1189_v26, %v1193_v28  ;;  %v131_v44 = vld [vmem:[%s129_s15 + $0x8] sm:$0xff] }
  0x5f   : > { %299 = vmatprep.subr.bf16.mxu0 %v691_v43  ;;  %340 = vmatprep.subr.bf16.mxu1 %v693_v45  ;;  %v706_v36 = vcombine.low %v1187_v25, %v1191_v27  ;;  %v711_v37 = vcombine.high %v1195_v29, %v1199_v31  ;;  %v708_v38 = vcombine.low %v1189_v26, %v1193_v28  ;;  %v130_v43 = vld [vmem:[%s129_s15] sm:$0xff]  ;;  %v132_v45 = vld [vmem:[%s129_s15 + $0x10] sm:$0xff] }
  0x60   : > { %409 = vperm.xlu0 %840, %v407_v52   ;;  %v713_v39 = vcombine.high %v1197_v30, %v1201_v32  ;;  %v710_v40 = vcombine.low %v1195_v29, %v1199_v31  ;;  %v712_v41 = vcombine.low %v1197_v30, %v1201_v32  ;;  %v134_v42 = vpack.c.bf16 %v1017_v35, %v1017_v35 }
  0x62   : > { %300 = vmatpush1.bf16.msra.mxu0 %v690_v47  ;;  %341 = vmatpush1.bf16.msra.mxu1 %v692_v49  ;;  %v133_v47 = vld [vmem:[%s129_s15 + $0x18] sm:$0xff] }
  0x63   : > { %301 = vmatprep.subr.bf16.mxu0 %v695_v48  ;;  %342 = vmatprep.subr.bf16.mxu1 %v697_v51 }
  0x66   : > { %302 = vmatpush1.bf16.msra.mxu0 %v694_v53  ;;  %343 = vmatpush1.bf16.msra.mxu1 %v696_v55 }
  0x67   : > { %303 = vmatprep.subr.bf16.mxu0 %v699_v54  ;;  %344 = vmatprep.subr.bf16.mxu1 %v701_v56 }
  0x6a   : > { %304 = vmatpush1.bf16.msra.mxu0 %v698_v57  ;;  %345 = vmatpush1.bf16.msra.mxu1 %v700_v59 }
  0x6b   : > { %305 = vmatprep.subr.bf16.mxu0 %v703_v58  ;;  %346 = vmatprep.subr.bf16.mxu1 %v705_v60 }
  0x6e   : > { %306 = vmatpush1.bf16.msra.mxu0 %v702_v61  ;;  %347 = vmatpush1.bf16.msra.mxu1 %v704_v63 }
  0x6f   : > { %307 = vmatprep.subr.bf16.mxu0 %v707_v62  ;;  %348 = vmatprep.subr.bf16.mxu1 %v709_v33 }
  0x72   : > { %308 = vmatpush1.bf16.msra.mxu0 %v706_v36  ;;  %349 = vmatpush1.bf16.msra.mxu1 %v708_v38 }
  0x73   : > { %309 = vmatprep.subr.bf16.mxu0 %v711_v37  ;;  %350 = vmatprep.subr.bf16.mxu1 %v713_v39 }
  0x76   : > { %310 = vmatpush1.bf16.msra.mxu0 %v710_v40  ;;  %351 = vmatpush1.bf16.msra.mxu1 %v712_v41 }
  0x79   : > { %328 = vmatmul.mubr.bf16.vlgmr.msra.gmra.mrb[0].mxu0 %v134_v42  ;;  %369 = vmatmul.mubr.bf16.vlgmr.msra.gmra.mrb[0].mxu1 %v134_v42 }
  0xdf   : > { %v410_v41 = vpop.permute.xlu0 %409 }
  0xe0   : > { %vm411_vm1 = vcmp.eq.s32.totalorder %v410_v41, 1 }
 0x14c   : > { %v329_v46 = vpop.f32.mrb[0].mxu0  ;;  %v370_v50 = vpop.f32.mrb[0].mxu1 }
 0x14d   : > { %v377_v48 = vadd.f32 %v329_v46, %v130_v43  ;;  %v331_v49 = vpop.f32.mrb[1].mxu0  ;;  %v379_v53 = vadd.f32 %v370_v50, %v132_v45  ;;  %v372_v54 = vpop.f32.mrb[1].mxu1 }
 0x14e   : > { %v378_v51 = vadd.f32 %v331_v49, %v131_v44  ;;  %v333_v52 = vpop.f32.mrb[2].mxu0  ;;  %v380_v57 = vadd.f32 %v372_v54, %v133_v47  ;;  %v374_v58 = vpop.f32.mrb[2].mxu1 }
 0x14f   : > { %v714_v55 = vmul.f32 -1.442695, %v377_v48  ;;  %v334_v56 = vpop.f32.mrb[3].mxu0  ;;  %v375_v60 = vpop.f32.mrb[3].mxu1 }
 0x150   : > { %v715_v59 = vmul.f32 -1.442695, %v378_v51  ;;  %v716_v61 = vmul.f32 -1.442695, %v380_v57 }
 0x151   : > { %841 = vpow2.f32 %v714_v55 }
 0x152   : > { %843 = vpow2.f32 %v715_v59 }
 0x153   : > { %845 = vpow2.f32 %v716_v61 }
 0x154   : > { %847 = vtanh.f32 %v379_v53 }
 0x15b   : > { %v842_v62 = vpop.eup %841 }
 0x15c   : > { %v844_v63 = vpop.eup %843  ;;  %v384_v33 = vadd.f32 1.0, %v842_v62 }
 0x15d   : > { %v390_v36 = vadd.f32 1.0, %v844_v63  ;;  %v846_v37 = vpop.eup %845 }
 0x15e   : > { %849 = vrcp.f32 %v384_v33  ;;  %v848_v38 = vpop.eup %847  ;;  %v397_v40 = vadd.f32 1.0, %v846_v37 }
 0x15f   : > { %851 = vrcp.f32 %v390_v36 }
 0x160   : > { %853 = vrcp.f32 %v397_v40 }
 0x168   : > { %v850_v39 = vpop.eup %849 }
 0x169   : > { %v852_v42 = vpop.eup %851  ;;  %v401_v43 = vmul.f32 %v850_v39, %v848_v38 }
 0x16a   : > { %v400_v44 = vmul.f32 %v1013_v34, %v852_v42  ;;  %v854_v46 = vpop.eup %853 }
 0x16c   : > { %v402_v45 = vadd.f32 %v401_v43, %v400_v44 }
 0x16e   : > { %855 = vtanh.f32 %v402_v45  ;;  %v413_v34 = vsel %vm411_vm1, %v402_v45, %v1013_v34  }
 0x176   :  { %124 = sbr.rel (!%p121_p5) target bundleno = 87 (0x57), region = 72 }
 0x178   : > { %v856_v47 = vpop.eup %855 }
 0x179   : > { %v404_v48 = vmul.f32 %v856_v47, %v854_v46 }
 0x17b   : > { %v412_v49 = vsel %vm411_vm1, %v404_v48, %v1017_v35  }
 0x17c   : > { %v1335_v35 = vmov %v412_v49  ;;  %v1336_v33 = vmov (%p121_p5), %v412_v49 }
 0x17d PF:  { %v857_v35 = vld [vmem:[#allocation9] sm:$0xff]   ;;  %v1038_v50 = vmov 0.0   ;;  %v858_v51 = vld [vmem:[#allocation9 + $0x8] sm:$0xff]   ;;  %vm1039_vm2 = vmmov 0   ;;  %v859_v52 = vld [vmem:[#allocation9 + $0x10] sm:$0xff]   ;;  %v414_v10 = vpack.c.bf16 %v1025_v33, %v1025_v33  ;;  %v1025_v33 = vphi %v1206_v33, %v1336_v33  }
 0x17e   :  { %754 = vmatprep.subr.bf16.mxu0 %v1038_v50  ;;  %774 = vmatprep.subr.bf16.mxu1 %v1038_v50  ;;  %v865_v53 = vld [vmem:[#allocation10] sm:$0xff]   ;;  %v860_v0 = vld [vmem:[#allocation9 + $0x18] sm:$0xff]   ;;  %v866_v1 = vld [vmem:[#allocation10 + $0x8] sm:$0xff]  }
 0x17f   :  { %755 = vmatpush3.bf16.msra.mxu0 %v857_v35  ;;  %770 = vmatprep.mubr.msk.bf16.mxu0 %vm1039_vm2, %v1038_v50  ;;  %v861_v2 = vld [vmem:[#allocation9 + $0x20] sm:$0xff]   ;;  %v867_v3 = vld [vmem:[#allocation10 + $0x10] sm:$0xff]   ;;  %v862_v4 = vld [vmem:[#allocation9 + $0x28] sm:$0xff]  }
 0x180   :  { %756 = vmatprep.subr.bf16.mxu0 %v1038_v50  ;;  %790 = vmatprep.mubr.msk.bf16.mxu1 %vm1039_vm2, %v1038_v50  ;;  %v868_v5 = vld [vmem:[#allocation10 + $0x18] sm:$0xff]   ;;  %v863_v6 = vld [vmem:[#allocation9 + $0x30] sm:$0xff]   ;;  %v869_v7 = vld [vmem:[#allocation10 + $0x20] sm:$0xff]  }
 0x181   :  { %775 = vmatpush3.bf16.msra.mxu1 %v865_v53  ;;  %v864_v8 = vld [vmem:[#allocation9 + $0x38] sm:$0xff]   ;;  %v870_v9 = vld [vmem:[#allocation10 + $0x28] sm:$0xff]   ;;  %v871_v11 = vld [vmem:[#allocation10 + $0x30] sm:$0xff]  }
 0x182   :  { %776 = vmatprep.subr.bf16.mxu1 %v1038_v50  ;;  %v872_v12 = vld [vmem:[#allocation10 + $0x38] sm:$0xff]   ;;  %v717_v13 = vld [vmem:[%s1331_s5] ss:$0 sm:$0xff]  ;;  %s1040_s5 = smov [#allocation12]  }
 0x183   :  { %757 = vmatpush3.bf16.msra.mxu0 %v858_v51  ;;  %v726_v21 = vld [vmem:[%s1333_s7] ss:$0 sm:$0xff]  ;;  %s655_s20 = sshll.u32 %s1040_s5, 4  ;;  %s656_s20 = int_to_ptr.vmem [resolvable:$true] %s655_s20 }
 0x184   :  { %758 = vmatprep.subr.bf16.mxu0 %v1038_v50  ;;  %s965_s7 = scalar_lea.vmem %s656_s20, 128  ;;  %p970_p7 = scmp.lt.s32.totalorder %s656_s20, %s656_s20 }
 0x185   :  { %777 = vmatpush3.bf16.msra.mxu1 %v866_v1  ;;  %p966_p6 = scmp.ne.s32.totalorder %s656_s20, %s965_s7  ;;  %p971_p8 = scmp.lt.s32.totalorder %s965_s7, %s965_s7 }
 0x186   :  { %778 = vmatprep.subr.bf16.mxu1 %v1038_v50 }
 0x187   :  { %759 = vmatpush3.bf16.msra.mxu0 %v859_v52  ;;  %p972_p9 = por %p971_p8, %p970_p7 }
 0x188   :  { %760 = vmatprep.subr.bf16.mxu0 %v1038_v50 }
 0x189   :  { %779 = vmatpush3.bf16.msra.mxu1 %v867_v3  ;;  %p973_p10 = pnand %p972_p9, %p966_p6 }
 0x18a   :  { %780 = vmatprep.subr.bf16.mxu1 %v1038_v50 }
 0x18b   :  { %761 = vmatpush3.bf16.msra.mxu0 %v860_v0 }
 0x18c   :  { %762 = vmatprep.subr.bf16.mxu0 %v1038_v50 }
 0x18d   :  { %781 = vmatpush3.bf16.msra.mxu1 %v868_v5 }
 0x18e   :  { %782 = vmatprep.subr.bf16.mxu1 %v1038_v50 }
 0x18f   :  { %763 = vmatpush3.bf16.msra.mxu0 %v861_v2 }
 0x190   :  { %764 = vmatprep.subr.bf16.mxu0 %v1038_v50 }
 0x191   :  { %783 = vmatpush3.bf16.msra.mxu1 %v869_v7 }
 0x192   :  { %784 = vmatprep.subr.bf16.mxu1 %v1038_v50 }
 0x193   :  { %765 = vmatpush3.bf16.msra.mxu0 %v862_v4 }
 0x194   :  { %766 = vmatprep.subr.bf16.mxu0 %v1038_v50 }
 0x195   :  { %785 = vmatpush3.bf16.msra.mxu1 %v870_v9 }
 0x196   :  { %786 = vmatprep.subr.bf16.mxu1 %v1038_v50 }
 0x197   :  { %767 = vmatpush3.bf16.msra.mxu0 %v863_v6 }
 0x198   :  { %768 = vmatprep.subr.bf16.mxu0 %v1038_v50 }
 0x199   :  { %787 = vmatpush3.bf16.msra.mxu1 %v871_v11 }
 0x19a   :  { %788 = vmatprep.subr.bf16.mxu1 %v1038_v50 }
 0x19b   :  { %769 = vmatpush3.bf16.msra.mxu0 %v864_v8 }
 0x19d   :  { %789 = vmatpush3.bf16.msra.mxu1 %v872_v12 }
 0x19e   :  { %771 = vmatmul.mubr.bf16.vlgmr.msra.gmra.mrb[0].mxu0 %v414_v10 }
 0x271   :  { %v520_v14 = vpop.f32.mrb[0].mxu0 }
 0x272   :  { %v521_v15 = vadd.f32 %v717_v13, %v520_v14  ;;  %v772_v16 = vpop.f32.mrb[1].mxu0 }
 0x273   :  { %v523_v17 = vpop.f32.mrb[2].mxu0 }
 0x274   :  { %v526_v18 = vmax.f32 %v521_v15, 0.0  ;;  %v773_v19 = vpop.f32.mrb[3].mxu0 }
 0x276   :  { %v527_v20 = vpack.c.bf16 %v526_v18, %v526_v18 }
 0x278   :  { %791 = vmatmul.mubr.bf16.vlgmr.msra.gmra.mrb[0].mxu1 %v527_v20 }
 0x34b   :  { %v633_v22 = vpop.f32.mrb[0].mxu1 }
 0x34c   :  { %v634_v23 = vadd.f32 %v726_v21, %v633_v22  ;;  %v792_v24 = vpop.f32.mrb[1].mxu1 }
 0x34d   :  { %v636_v25 = vpop.f32.mrb[2].mxu1 }
 0x34e   :  { %639 = vmax.xlane.f32.xlu0 %v634_v23  ;;  %v793_v26 = vpop.f32.mrb[3].mxu1 }
 0x3db   :  { %v640_v27 = vpop.xlane.xlu0 %639 }
 0x3dc   :  { %v641_v28 = vsub.f32 %v634_v23, %v640_v27 }
 0x3de   :  { %v642_v29 = vmul.f32 1.442695, %v641_v28 }
 0x3e0   :  { %873 = vpow2.f32 %v642_v29 }
 0x3ea   :  { %v874_v30 = vpop.eup %873 }
 0x3eb   :  { %644 = vadd.xlane.f32.xlu0 %v874_v30 }
 0x478   :  { %v645_v31 = vpop.xlane.xlu0 %644 }
 0x479   :  { %875 = vrcp.f32 %v645_v31 }
 0x483   :  { %v876_v32 = vpop.eup %875 }
 0x484   :  { %v647_v34 = vmul.f32 %v876_v32, %v874_v30 }
 0x486   :  { %648 = vst [vmem:[#allocation12] sm:$0xff] %v647_v34 }
 0x487   :  { %976 = shalt.err (!%p973_p10)
}
 0x488   :  { %s977_s23 = scalar_lea.hbm %s1334_s8, 128 }
 0x489   :  { %p978_p11 = scmp.ne.s32.totalorder %s1334_s8, %s977_s23  ;;  %p981_p12 = scmp.lt.u32.totalorder %s977_s23, %s1334_s8 }
 0x48b   :  { %p983_p13 = pnand %p981_p12, %p978_p11 }
 0x48d   :  { %986 = shalt.err (!%p983_p13)
}
 0x48e   :  { %658 = dma.vmem_to_hbm [thread:$0]  %s656_s20, 128, %s1334_s8, [#allocation6]  }
 0x48f   :  { %1009 = dma.done.wait [#allocation6], 128  }
 0x490   :  { %1010 = vsyncadd [#allocation6], 4294967168 }
 0x491   :  { %662 = vsyncpa [#allocation5], 1 }
 0x492   :  { %663 = vsyncpa [#allocation8], 1 }
 0x493   :  { %664 = vsyncpa [#allocation11], 1 }
 0x494   :  { %665 = vsyncpa [#allocation6], 1 }

</bundles_post_ra>
